<compile_context>
chip_gen: v6e
topology: v6e:2x2x1
jax: 0.10.0
libtpu: 0.0.40
codegen_flags: <defaults>
</compile_context>

<pallas_src>
import numpy as np
import jax
import jax.numpy as jnp
from jax import lax
from jax.experimental import pallas as pl
from jax.experimental.pallas import tpu as pltpu

LANE = 128      # vreg lane width
SUBLANE = 8     # vreg sublane depth (f32)


def _round_up(x, m):
    return ((x + m - 1) // m) * m


def _make_dice_kernel(n_r, row_block, n_rows, n_full_blocks, needs_mask):
    """Build the kernel with the tiling config baked in as Python constants.

    Block shapes seen by the kernel:
      p_ref, t_ref:                    (8, row_block, 128)  input dtype (f32/bf16)
      inter_ref, psum_ref, tsum_ref:   (1, 8, 128)          f32, resident across r
    """

    def kernel(p_ref, t_ref, inter_ref, psum_ref, tsum_ref):
        r = pl.program_id(2)

        @pl.when(r == 0)
        def _init():
            inter_ref[...] = jnp.zeros_like(inter_ref)
            psum_ref[...] = jnp.zeros_like(psum_ref)
            tsum_ref[...] = jnp.zeros_like(tsum_ref)

        p = p_ref[...].astype(jnp.float32)   # cheap VPU upcast when inputs are bf16
        t = t_ref[...].astype(jnp.float32)

        def _accumulate(pp, tt):
            # Lane-wise partial sums: reduce only over the row (sublane) axis.
            # The cross-lane (axis=-1) sum is deferred to glue JAX on the tiny
            # (3, n_split, G, 128) result -> no per-step XLU lane reductions.
            inter_ref[0] += jnp.sum(pp * tt, axis=1)
            psum_ref[0] += jnp.sum(pp * pp, axis=1)
            tsum_ref[0] += jnp.sum(tt * tt, axis=1)

        if not needs_mask:
            _accumulate(p, t)
        else:
            # Global row-block index; only the tail / padding blocks need a mask,
            # so the mask code is gated off the hot path with pl.when.
            rg = pl.program_id(1) * n_r + r

            @pl.when(rg < n_full_blocks)
            def _full():
                _accumulate(p, t)

            @pl.when(rg >= n_full_blocks)
            def _ragged_tail():
                row = lax.broadcasted_iota(jnp.int32, p.shape, 1)
                keep = row < (n_rows - rg * row_block)   # <=0 for padding blocks
                _accumulate(jnp.where(keep, p, 0.0), jnp.where(keep, t, 0.0))

    return kernel


def dice_loss(pred, target, smooth=1.0, *, block_rows=512, vmem_limit_mb=None):
    """pred/target: (B, C, *spatial) arrays. Returns the scalar Dice loss.

    block_rows: rows (of 128 lanes) per grid step.  512 -> ~2 MiB per f32 input
    block (safe for v5e's 16 MiB default scoped VMEM).  On v6e/v7x, 1024-2048
    with vmem_limit_mb ~ 40 amortizes per-step overhead further.
    """
    assert pred.shape == target.shape
    assert pred.ndim >= 3, "expect (B, C, spatial...) inputs"
    B, C = int(pred.shape[0]), int(pred.shape[1])
    spatial = int(np.prod(pred.shape[2:]))
    G = B * C

    def _prep(x):
        # Keep bf16 as bf16 (halves HBM traffic); everything else goes to f32.
        dt = jnp.bfloat16 if x.dtype == jnp.bfloat16 else jnp.float32
        return jnp.asarray(x, dt).reshape(G, spatial)

    p2, t2 = _prep(pred), _prep(target)

    rem = spatial % LANE
    if rem:
        # TODO(synk): fallback pad costs an extra HBM pass; only hit when
        # spatial is not a multiple of 128 (zeros are exact no-ops for all sums).
        p2 = jnp.pad(p2, ((0, 0), (0, LANE - rem)))
        t2 = jnp.pad(t2, ((0, 0), (0, LANE - rem)))
    R = p2.shape[1] // LANE
    p3 = p2.reshape(G, R, LANE)          # zero-copy views in the common case
    t3 = t2.reshape(G, R, LANE)

    # Row-block size: multiple of 16 if any bf16 input (bf16 min tile (16,128)),
    # else multiple of 8.
    sub = 16 if (p3.dtype == jnp.bfloat16 or t3.dtype == jnp.bfloat16) else SUBLANE
    Rt = _round_up(max(1, min(block_rows, R)), sub)

    Gt = SUBLANE                          # 8 (b, c) samples per step (sublane-dense)
    n_g = pl.cdiv(G, Gt)
    n_blocks = pl.cdiv(R, Rt)
    # Guarantee >= 2 "parallel" grid steps so v7x's second TensorCore has work.
    n_split = 2 if (n_g == 1 and n_blocks >= 2) else 1
    n_r = pl.cdiv(n_blocks, n_split)
    n_full = R // Rt                      # row-blocks containing only valid rows
    needs_mask = (n_split * n_r * Rt) != R

    if n_split * n_r == n_blocks:
        in_map = lambda g, s, r: (g, s * n_r + r, 0)
    else:
        # Clamp padding blocks onto the last real block; their contribution is
        # zeroed by the in-kernel mask, so no out-of-range DMA is ever issued.
        in_map = lambda g, s, r: (g, jnp.minimum(s * n_r + r, n_blocks - 1), 0)
    out_map = lambda g, s, r: (s, g, 0)

    Gp = n_g * Gt
    out_sds = jax.ShapeDtypeStruct((n_split, Gp, LANE), jnp.float32)
    out_spec = pl.BlockSpec((1, Gt, LANE), out_map)

    grid_spec = pltpu.PrefetchScalarGridSpec(
        num_scalar_prefetch=0,
        grid=(n_g, n_split, n_r),
        in_specs=[
            pl.BlockSpec((Gt, Rt, LANE), in_map),
            pl.BlockSpec((Gt, Rt, LANE), in_map),
        ],
        out_specs=[out_spec, out_spec, out_spec],
    )

    cost = pl.CostEstimate(
        flops=6 * G * spatial,            # 3 muls + 3 adds per element
        transcendentals=0,
        bytes_accessed=G * spatial * (p3.dtype.itemsize + t3.dtype.itemsize)
        + 3 * n_split * Gp * LANE * 4,
    )

    cp_kwargs = dict(dimension_semantics=("parallel", "parallel", "arbitrary"))
    if vmem_limit_mb is not None:
        cp_kwargs["vmem_limit_bytes"] = int(vmem_limit_mb) << 20

    inter_p, psum_p, tsum_p = pl.pallas_call(
        _make_dice_kernel(n_r, Rt, R, n_full, needs_mask),
        out_shape=(out_sds, out_sds, out_sds),
        grid_spec=grid_spec,
        compiler_params=pltpu.CompilerParams(**cp_kwargs),
        cost_estimate=cost,
    )(p3, t3)

    def _finalize(x):                     # (n_split, Gp, 128) -> (B, C)
        return jnp.sum(x, axis=(0, 2))[:G].reshape(B, C)

    inter = _finalize(inter_p)
    psum = _finalize(psum_p)
    tsum = _finalize(tsum_p)

    dice = jnp.sum(2.0 * inter / (psum + tsum + smooth), axis=1) / C   # (B,)
    return jnp.clip(jnp.mean(1.0 - dice), 0.0, 1.0)


def _reference_numpy(pred, target, smooth=1.0):
    """Direct NumPy port of the PyTorch DiceLoss.forward for verification."""
    pred = np.asarray(pred, np.float64)
    target = np.asarray(target, np.float64)
    B, C = pred.shape[:2]
    dice = np.zeros(B, np.float64)
    for i in range(C):
        p = pred[:, i].reshape(B, -1)
        t = target[:, i].reshape(B, -1)
        inter = (p * t).sum(axis=1)
        denom = (p ** 2).sum(axis=1) + (t ** 2).sum(axis=1) + smooth
        dice += 2.0 * inter / denom
    dice /= C
    return float(np.clip((1.0 - dice).mean(), 0.0, 1.0))


if __name__ == "__main__":
    key = jax.random.PRNGKey(0)
    kp, kt, kp2, kt2 = jax.random.split(key, 4)

    # 5-D inputs (B, C, D, H, W), as implied by the three .sum(dim=1) calls per channel.
    B, C, D, H, W = 2, 4, 8, 16, 16
    pred = jax.nn.sigmoid(jax.random.normal(kp, (B, C, D, H, W), jnp.float32))
    target = (jax.random.uniform(kt, (B, C, D, H, W)) > 0.5).astype(jnp.float32)
    ref = _reference_numpy(np.asarray(pred), np.asarray(target))

    # 1) Default config: single row-block, no masking, no spatial split.
    loss = jax.block_until_ready(dice_loss(pred, target))
    assert np.allclose(float(loss), ref, rtol=1e-4, atol=1e-4), (float(loss), ref)

    # 2) Tiny row-blocks: exercises r-axis accumulation + the 2-way "parallel"
    #    spatial split (second v7x TensorCore path).
    loss2 = jax.block_until_ready(dice_loss(pred, target, block_rows=8))
    assert np.allclose(float(loss2), ref, rtol=1e-4, atol=1e-4), (float(loss2), ref)

    # 3) bf16 inputs streamed as bf16 (kernel upcasts and accumulates in f32).
    pred_bf = pred.astype(jnp.bfloat16)
    target_bf = target.astype(jnp.bfloat16)
    ref_bf = _reference_numpy(np.asarray(pred_bf.astype(jnp.float32)),
                              np.asarray(target_bf.astype(jnp.float32)))
    loss3 = jax.block_until_ready(dice_loss(pred_bf, target_bf))
    assert np.allclose(float(loss3), ref_bf, rtol=1e-4, atol=1e-4), (float(loss3), ref_bf)

    # 4) Ragged spatial extent (R % Rt != 0): in-kernel tail mask, no host-side pad.
    W2 = 20                               # spatial = 8*16*20 = 2560 -> R = 20 rows
    pred_r = jax.nn.sigmoid(jax.random.normal(kp2, (B, C, D, H, W2), jnp.float32))
    target_r = (jax.random.uniform(kt2, (B, C, D, H, W2)) > 0.5).astype(jnp.float32)
    ref_r = _reference_numpy(np.asarray(pred_r), np.asarray(target_r))
    loss4 = jax.block_until_ready(dice_loss(pred_r, target_r, block_rows=8))
    assert np.allclose(float(loss4), ref_r, rtol=1e-4, atol=1e-4), (float(loss4), ref_r)

    print("KERNEL_OK")
</pallas_src>

<mosaic_0001>
module attributes {stable_mosaic.version = 11 : i64} {
  func.func @kernel(%arg0: i32, %arg1: i32, %arg2: i32, %arg3: memref<8x16x128xf32, #tpu.memory_space<vmem>>, %arg4: memref<8x16x128xf32, #tpu.memory_space<vmem>>, %arg5: memref<1x8x128xf32, #tpu.memory_space<vmem>>, %arg6: memref<1x8x128xf32, #tpu.memory_space<vmem>>, %arg7: memref<1x8x128xf32, #tpu.memory_space<vmem>>) attributes {dimension_semantics = [#tpu.dimension_semantics<parallel>, #tpu.dimension_semantics<parallel>, #tpu.dimension_semantics<arbitrary>], iteration_bounds = array<i64: 1, 1, 1>, scalar_prefetch = 0 : i64, scratch_operands = 0 : i64, tpu.core_type = #tpu.core_type<tc>, window_params = [{transform_indices = @transform_0, window_bounds = array<i64: 8, 16, 128>}, {transform_indices = @transform_1, window_bounds = array<i64: 8, 16, 128>}, {transform_indices = @transform_2, window_bounds = array<i64: 1, 8, 128>}, {transform_indices = @transform_3, window_bounds = array<i64: 1, 8, 128>}, {transform_indices = @transform_4, window_bounds = array<i64: 1, 8, 128>}]} {
    %c0_i32 = arith.constant 0 : i32
    %0 = arith.cmpi eq, %arg2, %c0_i32 : i32
    %1 = arith.extui %0 : i1 to i32
    %c0_i32_0 = arith.constant 0 : i32
    %2 = arith.cmpi ne, %1, %c0_i32_0 : i32
    scf.if %2 {
      %cst_26 = arith.constant 0.000000e+00 : f32
      %29 = vector.broadcast %cst_26 : f32 to vector<1x8x128xf32>
      %c0_27 = arith.constant 0 : index
      %c0_28 = arith.constant 0 : index
      %c0_29 = arith.constant 0 : index
      %30 = vector.load %arg5[%c0_27, %c0_28, %c0_29] : memref<1x8x128xf32, #tpu.memory_space<vmem>>, vector<1x8x128xf32>
      tpu.vector_store %arg5[%c0_27, %c0_28, %c0_29], %29 {strides = array<i32>} : memref<1x8x128xf32, #tpu.memory_space<vmem>>, vector<1x8x128xf32>,
      %cst_30 = arith.constant 0.000000e+00 : f32
      %31 = vector.broadcast %cst_30 : f32 to vector<1x8x128xf32>
      %c0_31 = arith.constant 0 : index
      %c0_32 = arith.constant 0 : index
      %c0_33 = arith.constant 0 : index
      %32 = vector.load %arg6[%c0_31, %c0_32, %c0_33] : memref<1x8x128xf32, #tpu.memory_space<vmem>>, vector<1x8x128xf32>
      tpu.vector_store %arg6[%c0_31, %c0_32, %c0_33], %31 {strides = array<i32>} : memref<1x8x128xf32, #tpu.memory_space<vmem>>, vector<1x8x128xf32>,
      %cst_34 = arith.constant 0.000000e+00 : f32
      %33 = vector.broadcast %cst_34 : f32 to vector<1x8x128xf32>
      %c0_35 = arith.constant 0 : index
      %c0_36 = arith.constant 0 : index
      %c0_37 = arith.constant 0 : index
      %34 = vector.load %arg7[%c0_35, %c0_36, %c0_37] : memref<1x8x128xf32, #tpu.memory_space<vmem>>, vector<1x8x128xf32>
      tpu.vector_store %arg7[%c0_35, %c0_36, %c0_37], %33 {strides = array<i32>} : memref<1x8x128xf32, #tpu.memory_space<vmem>>, vector<1x8x128xf32>,
    } else {
    }
    %c0 = arith.constant 0 : index
    %c0_1 = arith.constant 0 : index
    %c0_2 = arith.constant 0 : index
    %3 = vector.load %arg3[%c0, %c0_1, %c0_2] : memref<8x16x128xf32, #tpu.memory_space<vmem>>, vector<8x16x128xf32>
    %c0_3 = arith.constant 0 : index
    %c0_4 = arith.constant 0 : index
    %c0_5 = arith.constant 0 : index
    %4 = vector.load %arg4[%c0_3, %c0_4, %c0_5] : memref<8x16x128xf32, #tpu.memory_space<vmem>>, vector<8x16x128xf32>
    %c0_6 = arith.constant 0 : index
    %c0_7 = arith.constant 0 : index
    %c0_8 = arith.constant 0 : index
    %5 = vector.load %arg5[%c0_6, %c0_7, %c0_8] : memref<1x8x128xf32, #tpu.memory_space<vmem>>, vector<1x8x128xf32>
    %6 = vector.shape_cast %5 : vector<1x8x128xf32> to vector<8x128xf32>
    %7 = arith.mulf %3, %4 : vector<8x16x128xf32>
    %cst = arith.constant dense<0.000000e+00> : vector<8x128xf32>
    %8 = vector.multi_reduction <add>, %7, %cst [1] : vector<8x16x128xf32> to vector<8x128xf32>
    %9 = arith.addf %6, %8 : vector<8x128xf32>
    %c0_9 = arith.constant 0 : index
    %c0_10 = arith.constant 0 : index
    %c0_11 = arith.constant 0 : index
    %10 = vector.load %arg5[%c0_9, %c0_10, %c0_11] : memref<1x8x128xf32, #tpu.memory_space<vmem>>, vector<1x8x128xf32>
    %11 = vector.shape_cast %10 : vector<1x8x128xf32> to vector<8x128xf32>
    %12 = vector.shape_cast %9 : vector<8x128xf32> to vector<1x8x128xf32>
    tpu.vector_store %arg5[%c0_9, %c0_10, %c0_11], %12 {strides = array<i32>} : memref<1x8x128xf32, #tpu.memory_space<vmem>>, vector<1x8x128xf32>,
    %c0_12 = arith.constant 0 : index
    %c0_13 = arith.constant 0 : index
    %c0_14 = arith.constant 0 : index
    %13 = vector.load %arg6[%c0_12, %c0_13, %c0_14] : memref<1x8x128xf32, #tpu.memory_space<vmem>>, vector<1x8x128xf32>
    %14 = vector.shape_cast %13 : vector<1x8x128xf32> to vector<8x128xf32>
    %15 = arith.mulf %3, %3 : vector<8x16x128xf32>
    %cst_15 = arith.constant dense<0.000000e+00> : vector<8x128xf32>
    %16 = vector.multi_reduction <add>, %15, %cst_15 [1] : vector<8x16x128xf32> to vector<8x128xf32>
    %17 = arith.addf %14, %16 : vector<8x128xf32>
    %c0_16 = arith.constant 0 : index
    %c0_17 = arith.constant 0 : index
    %c0_18 = arith.constant 0 : index
    %18 = vector.load %arg6[%c0_16, %c0_17, %c0_18] : memref<1x8x128xf32, #tpu.memory_space<vmem>>, vector<1x8x128xf32>
    %19 = vector.shape_cast %18 : vector<1x8x128xf32> to vector<8x128xf32>
    %20 = vector.shape_cast %17 : vector<8x128xf32> to vector<1x8x128xf32>
    tpu.vector_store %arg6[%c0_16, %c0_17, %c0_18], %20 {strides = array<i32>} : memref<1x8x128xf32, #tpu.memory_space<vmem>>, vector<1x8x128xf32>,
    %c0_19 = arith.constant 0 : index
    %c0_20 = arith.constant 0 : index
    %c0_21 = arith.constant 0 : index
    %21 = vector.load %arg7[%c0_19, %c0_20, %c0_21] : memref<1x8x128xf32, #tpu.memory_space<vmem>>, vector<1x8x128xf32>
    %22 = vector.shape_cast %21 : vector<1x8x128xf32> to vector<8x128xf32>
    %23 = arith.mulf %4, %4 : vector<8x16x128xf32>
    %cst_22 = arith.constant dense<0.000000e+00> : vector<8x128xf32>
    %24 = vector.multi_reduction <add>, %23, %cst_22 [1] : vector<8x16x128xf32> to vector<8x128xf32>
    %25 = arith.addf %22, %24 : vector<8x128xf32>
    %c0_23 = arith.constant 0 : index
    %c0_24 = arith.constant 0 : index
    %c0_25 = arith.constant 0 : index
    %26 = vector.load %arg7[%c0_23, %c0_24, %c0_25] : memref<1x8x128xf32, #tpu.memory_space<vmem>>, vector<1x8x128xf32>
    %27 = vector.shape_cast %26 : vector<1x8x128xf32> to vector<8x128xf32>
    %28 = vector.shape_cast %25 : vector<8x128xf32> to vector<1x8x128xf32>
    tpu.vector_store %arg7[%c0_23, %c0_24, %c0_25], %28 {strides = array<i32>} : memref<1x8x128xf32, #tpu.memory_space<vmem>>, vector<1x8x128xf32>,
    return
  }
  func.func @transform_0(%arg0: i32, %arg1: i32, %arg2: i32) -> (i32, i32, i32) {
    %c1_i32 = arith.constant 1 : i32
    %0 = arith.muli %arg1, %c1_i32 : i32
    %1 = arith.addi %0, %arg2 : i32
    %c0_i32 = arith.constant 0 : i32
    %c0_i32_0 = arith.constant 0 : i32
    return %arg0, %1, %c0_i32 : i32, i32, i32
  }
  func.func @transform_1(%arg0: i32, %arg1: i32, %arg2: i32) -> (i32, i32, i32) {
    %c1_i32 = arith.constant 1 : i32
    %0 = arith.muli %arg1, %c1_i32 : i32
    %1 = arith.addi %0, %arg2 : i32
    %c0_i32 = arith.constant 0 : i32
    %c0_i32_0 = arith.constant 0 : i32
    return %arg0, %1, %c0_i32 : i32, i32, i32
  }
  func.func @transform_2(%arg0: i32, %arg1: i32, %arg2: i32) -> (i32, i32, i32) {
    %c0_i32 = arith.constant 0 : i32
    %c0_i32_0 = arith.constant 0 : i32
    return %arg1, %arg0, %c0_i32 : i32, i32, i32
  }
  func.func @transform_3(%arg0: i32, %arg1: i32, %arg2: i32) -> (i32, i32, i32) {
    %c0_i32 = arith.constant 0 : i32
    %c0_i32_0 = arith.constant 0 : i32
    return %arg1, %arg0, %c0_i32 : i32, i32, i32
  }
  func.func @transform_4(%arg0: i32, %arg1: i32, %arg2: i32) -> (i32, i32, i32) {
    %c0_i32 = arith.constant 0 : i32
    %c0_i32_0 = arith.constant 0 : i32
    return %arg1, %arg0, %c0_i32 : i32, i32, i32
  }
}

</mosaic_0001>

<bundles_post_ra>
// kernel: tpu_custom_call.1
= control target key start
LH: loop header
LB: loop body
LE: loop exit
PB: predicated region body
PF: predicated region fallthrough
CT: control target
= control target key end

     0   :  { %10 = vsyncpa [#allocation3], 0  ;;  %s762_s0 = inlined_call_operand.hbm [shape: f32[8,16,128], index: 0, kind: input, shape index: {}]   ;;  %s763_s1 = inlined_call_operand.hbm [shape: f32[8,16,128], index: 1, kind: input, shape index: {}]   ;;  %s764_s2 = inlined_call_operand.hbm [shape: f32[1,8,128], index: 2, kind: output, shape index: {0}]   ;;  %s765_s3 = inlined_call_operand.hbm [shape: f32[1,8,128], index: 3, kind: output, shape index: {1}]   ;;  %s766_s4 = inlined_call_operand.hbm [shape: f32[1,8,128], index: 4, kind: output, shape index: {2}]  }
   0x1   :  { %11 = vsyncpa [#allocation6], 0 }
   0x2   :  { %12 = vsyncpa [#allocation4], 0 }
   0x3   :  { %13 = vsyncpa [#allocation9], 0  ;;  %s534_s15 = smov [#allocation2]  }
   0x4   :  { %s23_s16 = sshll.u32 %s534_s15, 4  ;;  %s24_s16 = int_to_ptr.vmem [resolvable:$true] %s23_s16 }
   0x5   :  { %s434_s17 = scalar_lea.vmem %s24_s16, 2048  ;;  %p439_p1 = scmp.lt.s32.totalorder %s24_s16, %s24_s16 }
   0x6   :  { %p435_p0 = scmp.ne.s32.totalorder %s24_s16, %s434_s17  ;;  %p440_p2 = scmp.lt.s32.totalorder %s434_s17, %s434_s17 }
   0x8   :  { %p441_p3 = por %p440_p2, %p439_p1 }
   0xa   :  { %p442_p4 = pnand %p441_p3, %p435_p0 }
   0xc   :  { %445 = shalt.err (!%p442_p4)
}
   0xd   :  { %s535_s18 = smov 128   ;;  %s536_s19 = smov 8  }
   0xe   :  { %29 = dma.hbm_to_vmem [thread:$0]  %s762_s0, 2048, %s24_s16, [#allocation3], %s535_s18, %s535_s18, %s536_s19  }
   0xf   :  { %s537_s22 = smov [#allocation5]  }
  0x10   :  { %s39_s23 = sshll.u32 %s537_s22, 4  ;;  %s40_s23 = int_to_ptr.vmem [resolvable:$true] %s39_s23 }
  0x11   :  { %s454_s24 = scalar_lea.vmem %s40_s23, 2048  ;;  %p459_p6 = scmp.lt.s32.totalorder %s40_s23, %s40_s23 }
  0x12   :  { %p455_p5 = scmp.ne.s32.totalorder %s40_s23, %s454_s24  ;;  %p460_p7 = scmp.lt.s32.totalorder %s454_s24, %s454_s24 }
  0x14   :  { %p461_p8 = por %p460_p7, %p459_p6 }
  0x16   :  { %p462_p9 = pnand %p461_p8, %p455_p5 }
  0x18   :  { %465 = shalt.err (!%p462_p9)
}
  0x19   :  { %45 = dma.hbm_to_vmem [thread:$0]  %s763_s1, 2048, %s40_s23, [#allocation6], %s535_s18, %s535_s18, %s536_s19  }
  0x1a   :  { %526 = dma.done.wait [#allocation3], 2048  }
  0x1b   :  { %527 = vsyncadd [#allocation3], 4294965248 }
  0x1c   :  { %528 = dma.done.wait [#allocation6], 2048  }
  0x1d   :  { %529 = vsyncadd [#allocation6], 4294965248  ;;  %v572_v0 = vld [vmem:[#allocation2] sm:$0xff]  ;;  %v574_v1 = vld [vmem:[#allocation2 + $0x8] sm:$0xff]  ;;  %vm176_vm0 = vcmask 1041409   ;;  %vm178_vm1 = vcmask 1042434  }
  0x1e   :  { %v576_v2 = vld [vmem:[#allocation2 + $0x10] sm:$0xff]  ;;  %v578_v3 = vld [vmem:[#allocation2 + $0x18] sm:$0xff]  ;;  %v580_v4 = vld [vmem:[#allocation2 + $0x20] sm:$0xff]  ;;  %v194_v6 = vmul.f32 %v572_v0, %v572_v0  ;;  %v195_v7 = vmul.f32 %v574_v1, %v574_v1  ;;  %vm180_vm2 = vcmask 1043459   ;;  %vm182_vm3 = vcmask 1044484   ;;  %s538_s0 = smov [#allocation8]  }
  0x1f   :  { %v582_v5 = vld [vmem:[#allocation2 + $0x28] sm:$0xff]  ;;  %v196_v8 = vmul.f32 %v576_v2, %v576_v2  ;;  %v590_v9 = vld [vmem:[#allocation2 + $0x30] sm:$0xff]  ;;  %v592_v10 = vld [vmem:[#allocation2 + $0x38] sm:$0xff]  ;;  %v197_v12 = vmul.f32 %v578_v3, %v578_v3  ;;  %v198_v13 = vmul.f32 %v580_v4, %v580_v4  ;;  %vm184_vm4 = vcmask 1045509   ;;  %s391_s1 = sshll.u32 %s538_s0, 4  ;;  %s392_s1 = int_to_ptr.vmem [resolvable:$true] %s391_s1 }
  0x20   :  { %v594_v11 = vld [vmem:[#allocation2 + $0x40] sm:$0xff]  ;;  %v199_v14 = vmul.f32 %v582_v5, %v582_v5  ;;  %v602_v15 = vld [vmem:[#allocation2 + $0x48] sm:$0xff]  ;;  %v604_v16 = vld [vmem:[#allocation2 + $0x50] sm:$0xff]  ;;  %v200_v18 = vmul.f32 %v590_v9, %v590_v9  ;;  %v201_v19 = vmul.f32 %v592_v10, %v592_v10  ;;  %v210_v21 = vadd.f32 %v195_v7, %v194_v6  ;;  %s466_s27 = scalar_lea.vmem %s392_s1, 128  ;;  %p471_p11 = scmp.lt.s32.totalorder %s392_s1, %s392_s1 }
  0x21   :  { %v606_v17 = vld [vmem:[#allocation2 + $0x58] sm:$0xff]  ;;  %v202_v20 = vmul.f32 %v594_v11, %v594_v11  ;;  %v614_v22 = vld [vmem:[#allocation2 + $0x60] sm:$0xff]  ;;  %v616_v23 = vld [vmem:[#allocation2 + $0x68] sm:$0xff]  ;;  %v203_v25 = vmul.f32 %v602_v15, %v602_v15  ;;  %v204_v26 = vmul.f32 %v604_v16, %v604_v16  ;;  %v217_v28 = vadd.f32 %v197_v12, %v196_v8  ;;  %p467_p10 = scmp.ne.s32.totalorder %s392_s1, %s466_s27  ;;  %p472_p12 = scmp.lt.s32.totalorder %s466_s27, %s466_s27 }
  0x22   :  { %v618_v24 = vld [vmem:[#allocation2 + $0x70] sm:$0xff]  ;;  %v205_v27 = vmul.f32 %v606_v17, %v606_v17  ;;  %v626_v29 = vld [vmem:[#allocation2 + $0x78] sm:$0xff]  ;;  %v206_v30 = vmul.f32 %v614_v22, %v614_v22  ;;  %v207_v31 = vmul.f32 %v616_v23, %v616_v23  ;;  %v211_v33 = vrot.slane %v210_v21, 4 }
  0x23   :  { %v208_v32 = vmul.f32 %v618_v24, %v618_v24  ;;  %v209_v34 = vmul.f32 %v626_v29, %v626_v29  ;;  %v218_v35 = vrot.slane %v217_v28, 4  ;;  %v224_v36 = vadd.f32 %v199_v14, %v198_v13  ;;  %p473_p13 = por %p472_p12, %p471_p11 }
  0x24   :  { %v231_v37 = vadd.f32 %v201_v19, %v200_v18  ;;  %v212_v38 = vadd.f32 %v211_v33, %v210_v21  ;;  %v238_v39 = vadd.f32 %v203_v25, %v202_v20  ;;  %v245_v40 = vadd.f32 %v205_v27, %v204_v26  ;;  %v636_v18 = vld [vmem:[#allocation5] sm:$0xff] }
  0x25   :  { %v252_v41 = vadd.f32 %v207_v31, %v206_v30  ;;  %v219_v42 = vadd.f32 %v218_v35, %v217_v28  ;;  %v225_v43 = vrot.slane %v224_v36, 4  ;;  %v259_v45 = vadd.f32 %v209_v34, %v208_v32  ;;  %v638_v31 = vld [vmem:[#allocation5 + $0x8] sm:$0xff]  ;;  %v640_v35 = vld [vmem:[#allocation5 + $0x10] sm:$0xff]  ;;  %p474_p0 = pnand %p473_p13, %p467_p10 }
  0x26   :  { %v232_v44 = vrot.slane %v231_v37, 4  ;;  %v213_v46 = vrot.slane %v212_v38, 2  ;;  %v239_v47 = vrot.slane %v238_v39, 4  ;;  %v246_v48 = vrot.slane %v245_v40, 4 }
  0x27   :  { %v253_v49 = vrot.slane %v252_v41, 4  ;;  %v220_v50 = vrot.slane %v219_v42, 2  ;;  %v226_v51 = vadd.f32 %v225_v43, %v224_v36  ;;  %v260_v53 = vrot.slane %v259_v45, 4  ;;  %v642_v36 = vld [vmem:[#allocation5 + $0x18] sm:$0xff]  ;;  %v649_v43 = vld [vmem:[#allocation5 + $0x28] sm:$0xff] }
  0x28   :  { %v233_v52 = vadd.f32 %v232_v44, %v231_v37  ;;  %v214_v54 = vadd.f32 %v213_v46, %v212_v38  ;;  %v240_v55 = vadd.f32 %v239_v47, %v238_v39  ;;  %v247_v56 = vadd.f32 %v246_v48, %v245_v40  ;;  %v651_v44 = vld [vmem:[#allocation5 + $0x30] sm:$0xff]  ;;  %v653_v48 = vld [vmem:[#allocation5 + $0x38] sm:$0xff] }
  0x29   :  { %v254_v57 = vadd.f32 %v253_v49, %v252_v41  ;;  %v221_v58 = vadd.f32 %v220_v50, %v219_v42  ;;  %v227_v59 = vrot.slane %v226_v51, 2  ;;  %v261_v61 = vadd.f32 %v260_v53, %v259_v45  ;;  %v647_v42 = vld [vmem:[#allocation5 + $0x20] sm:$0xff]  ;;  %v657_v50 = vld [vmem:[#allocation5 + $0x48] sm:$0xff]  ;;  %v662_v53 = vld [vmem:[#allocation5 + $0x50] sm:$0xff] }
  0x2a   :  { %v234_v60 = vrot.slane %v233_v52, 2  ;;  %vm186_vm5 = vcmask 1046534   ;;  %v215_v62 = vrot.slane %v214_v54, 1  ;;  %v241_v63 = vrot.slane %v240_v55, 2  ;;  %v655_v49 = vld [vmem:[#allocation5 + $0x40] sm:$0xff] }
  0x2b   :  { %v248_v6 = vrot.slane %v247_v56, 2  ;;  %v255_v7 = vrot.slane %v254_v57, 2  ;;  %vm188_vm6 = vcmask 1047559   ;;  %v222_v8 = vrot.slane %v221_v58, 1 }
  0x2c   :  { %v228_v12 = vadd.f32 %v227_v59, %v226_v51  ;;  %v235_v13 = vadd.f32 %v234_v60, %v233_v52  ;;  %v262_v14 = vrot.slane %v261_v61, 2  ;;  %v216_v19 = vadd.f32 %v215_v62, %v214_v54  ;;  %v664_v54 = vld [vmem:[#allocation5 + $0x58] sm:$0xff]  ;;  %v673_v59 = vld [vmem:[#allocation5 + $0x68] sm:$0xff] }
  0x2d   :  { %v242_v20 = vadd.f32 %v241_v63, %v240_v55  ;;  %v249_v21 = vadd.f32 %v248_v6, %v247_v56  ;;  %v256_v25 = vadd.f32 %v255_v7, %v254_v57  ;;  %v223_v26 = vadd.f32 %v222_v8, %v221_v58  ;;  %v666_v55 = vld [vmem:[#allocation5 + $0x60] sm:$0xff]  ;;  %v677_v60 = vld [vmem:[#allocation5 + $0x78] sm:$0xff] }
  0x2e   :  { %v229_v27 = vrot.slane %v228_v12, 1  ;;  %v236_v28 = vrot.slane %v235_v13, 1  ;;  %v263_v30 = vadd.f32 %v262_v14, %v261_v61  ;;  %v96_v37 = vmul.f32 %v636_v18, %v572_v0 }
  0x2f   :  { %v243_v32 = vrot.slane %v242_v20, 1  ;;  %v250_v33 = vrot.slane %v249_v21, 1  ;;  %v257_v34 = vrot.slane %v256_v25, 1  ;;  %v274_v41 = vsel %vm176_vm0, %v223_v26, %v216_v19 }
  0x30   :  { %v230_v38 = vadd.f32 %v229_v27, %v228_v12  ;;  %v237_v39 = vadd.f32 %v236_v28, %v235_v13  ;;  %v264_v40 = vrot.slane %v263_v30, 1  ;;  %v97_v0 = vmul.f32 %v638_v31, %v574_v1  ;;  %v675_v1 = vld [vmem:[#allocation5 + $0x70] sm:$0xff] }
  0x31   :  { %v244_v45 = vadd.f32 %v243_v32, %v242_v20  ;;  %v251_v46 = vadd.f32 %v250_v33, %v249_v21  ;;  %v258_v47 = vadd.f32 %v257_v34, %v256_v25  ;;  %v98_v56 = vmul.f32 %v640_v35, %v576_v2 }
  0x32   :  { %v265_v51 = vadd.f32 %v264_v40, %v263_v30  ;;  %v275_v52 = vsel %vm178_vm1, %v230_v38, %v274_v41  ;;  %v99_v57 = vmul.f32 %v642_v36, %v578_v3  ;;  %v100_v61 = vmul.f32 %v647_v42, %v580_v4 }
  0x33   :  { %v276_v58 = vsel %vm180_vm2, %v237_v39, %v275_v52  ;;  %v101_v62 = vmul.f32 %v649_v43, %v582_v5  ;;  %v102_v2 = vmul.f32 %v651_v44, %v590_v9  ;;  %v103_v3 = vmul.f32 %v653_v48, %v592_v10 }
  0x34   :  { %v277_v63 = vsel %vm182_vm3, %v244_v45, %v276_v58  ;;  %v104_v6 = vmul.f32 %v655_v49, %v594_v11  ;;  %v105_v7 = vmul.f32 %v657_v50, %v602_v15  ;;  %v106_v4 = vmul.f32 %v662_v53, %v604_v16 }
  0x35   :  { %v278_v8 = vsel %vm184_vm4, %v251_v46, %v277_v63  ;;  %v107_v5 = vmul.f32 %v664_v54, %v606_v17  ;;  %v108_v9 = vmul.f32 %v666_v55, %v614_v22  ;;  %v109_v11 = vmul.f32 %v673_v59, %v616_v23 }
  0x36   :  { %v279_v10 = vsel %vm186_vm5, %v258_v47, %v278_v8  ;;  %v110_v15 = vmul.f32 %v675_v1, %v618_v24  ;;  %v111_v12 = vmul.f32 %v677_v60, %v626_v29  ;;  %v112_v13 = vadd.f32 %v97_v0, %v96_v37 }
  0x37   :  { %v280_v16 = vsel %vm188_vm6, %v265_v51, %v279_v10  ;;  %v119_v17 = vadd.f32 %v99_v57, %v98_v56  ;;  %v126_v14 = vadd.f32 %v101_v62, %v100_v61  ;;  %v133_v19 = vadd.f32 %v103_v3, %v102_v2 }
  0x38   :  { %v140_v22 = vadd.f32 %v105_v7, %v104_v6  ;;  %v147_v20 = vadd.f32 %v107_v5, %v106_v4  ;;  %v113_v21 = vrot.slane %v112_v13, 4  ;;  %v154_v27 = vadd.f32 %v109_v11, %v108_v9  ;;  %283 = vst [vmem:[#allocation8] sm:$0xff] %v280_v16 }
  0x39   :  { %v120_v25 = vrot.slane %v119_v17, 4  ;;  %v127_v26 = vrot.slane %v126_v14, 4  ;;  %v134_v23 = vrot.slane %v133_v19, 4  ;;  %v161_v30 = vadd.f32 %v111_v12, %v110_v15 }
  0x3a   :  { %v141_v28 = vrot.slane %v140_v22, 4  ;;  %v148_v24 = vrot.slane %v147_v20, 4  ;;  %v114_v32 = vadd.f32 %v113_v21, %v112_v13  ;;  %v155_v34 = vrot.slane %v154_v27, 4 }
  0x3b   :  { %v121_v29 = vadd.f32 %v120_v25, %v119_v17  ;;  %v128_v33 = vadd.f32 %v127_v26, %v126_v14 }
  0x3c   :  { %477 = shalt.err (!%p474_p0)
}
  0x3d   :  { %394 = dma.vmem_to_hbm [thread:$0]  %s392_s1, 128, %s765_s3, [#allocation9]   ;;  %v135_v37 = vadd.f32 %v134_v23, %v133_v19  ;;  %v142_v38 = vadd.f32 %v141_v28, %v140_v22  ;;  %v149_v39 = vadd.f32 %v148_v24, %v147_v20  ;;  %v162_v40 = vrot.slane %v161_v30, 4 }
  0x3e   :  { %v115_v41 = vrot.slane %v114_v32, 2  ;;  %v122_v45 = vrot.slane %v121_v29, 2  ;;  %v129_v46 = vrot.slane %v128_v33, 2  ;;  %v156_v47 = vadd.f32 %v155_v34, %v154_v27  ;;  %s539_s3 = smov [#allocation7]  }
  0x3f   :  { %v136_v0 = vrot.slane %v135_v37, 2  ;;  %v143_v51 = vrot.slane %v142_v38, 2  ;;  %v150_v52 = vrot.slane %v149_v39, 2  ;;  %v163_v56 = vadd.f32 %v162_v40, %v161_v30  ;;  %s381_s30 = sshll.u32 %s539_s3, 4  ;;  %s382_s30 = int_to_ptr.vmem [resolvable:$true] %s381_s30 }
  0x40   :  { %v116_v57 = vadd.f32 %v115_v41, %v114_v32  ;;  %v123_v58 = vadd.f32 %v122_v45, %v121_v29  ;;  %v130_v61 = vadd.f32 %v129_v46, %v128_v33  ;;  %v157_v62 = vrot.slane %v156_v47, 2  ;;  %s486_s5 = scalar_lea.vmem %s382_s30, 128  ;;  %p491_p2 = scmp.lt.s32.totalorder %s382_s30, %s382_s30 }
  0x41   :  { %v137_v2 = vadd.f32 %v136_v0, %v135_v37  ;;  %v144_v63 = vadd.f32 %v143_v51, %v142_v38  ;;  %v151_v3 = vadd.f32 %v150_v52, %v149_v39  ;;  %v164_v6 = vrot.slane %v163_v56, 2  ;;  %p487_p1 = scmp.ne.s32.totalorder %s382_s30, %s486_s5  ;;  %p492_p3 = scmp.lt.s32.totalorder %s486_s5, %s486_s5 }
  0x42   :  { %v117_v7 = vrot.slane %v116_v57, 1  ;;  %v124_v8 = vrot.slane %v123_v58, 1  ;;  %v131_v4 = vrot.slane %v130_v61, 1  ;;  %v158_v5 = vadd.f32 %v157_v62, %v156_v47 }
  0x43   :  { %v138_v9 = vrot.slane %v137_v2, 1  ;;  %v145_v10 = vrot.slane %v144_v63, 1  ;;  %v152_v11 = vrot.slane %v151_v3, 1  ;;  %v165_v15 = vadd.f32 %v164_v6, %v163_v56  ;;  %p493_p4 = por %p492_p3, %p491_p2 }
  0x44   :  { %v118_v12 = vadd.f32 %v117_v7, %v116_v57  ;;  %v125_v16 = vadd.f32 %v124_v8, %v123_v58  ;;  %v132_v13 = vadd.f32 %v131_v4, %v130_v61  ;;  %v159_v17 = vrot.slane %v158_v5, 1 }
  0x45   :  { %v139_v14 = vadd.f32 %v138_v9, %v137_v2  ;;  %v146_v19 = vadd.f32 %v145_v10, %v144_v63  ;;  %v153_v22 = vadd.f32 %v152_v11, %v151_v3  ;;  %v166_v20 = vrot.slane %v165_v15, 1  ;;  %p494_p5 = pnand %p493_p4, %p487_p1 }
  0x46   :  { %v160_v21 = vadd.f32 %v159_v17, %v158_v5  ;;  %v177_v25 = vsel %vm176_vm0, %v125_v16, %v118_v12  ;;  %v285_v26 = vmul.f32 %v636_v18, %v636_v18  ;;  %v286_v27 = vmul.f32 %v638_v31, %v638_v31 }
  0x47   :  { %v167_v23 = vadd.f32 %v166_v20, %v165_v15  ;;  %v179_v28 = vsel %vm178_vm1, %v132_v13, %v177_v25  ;;  %v287_v24 = vmul.f32 %v640_v35, %v640_v35  ;;  %v288_v30 = vmul.f32 %v642_v36, %v642_v36 }
  0x48   :  { %v181_v32 = vsel %vm180_vm2, %v139_v14, %v179_v28  ;;  %v289_v29 = vmul.f32 %v647_v42, %v647_v42  ;;  %v290_v18 = vmul.f32 %v649_v43, %v649_v43  ;;  %v291_v31 = vmul.f32 %v651_v44, %v651_v44 }
  0x49   :  { %v183_v33 = vsel %vm182_vm3, %v146_v19, %v181_v32  ;;  %v292_v34 = vmul.f32 %v653_v48, %v653_v48  ;;  %v293_v35 = vmul.f32 %v655_v49, %v655_v49  ;;  %v294_v36 = vmul.f32 %v657_v50, %v657_v50 }
  0x4a   :  { %v185_v37 = vsel %vm184_vm4, %v153_v22, %v183_v33  ;;  %v295_v42 = vmul.f32 %v662_v53, %v662_v53  ;;  %v296_v43 = vmul.f32 %v664_v54, %v664_v54  ;;  %v297_v44 = vmul.f32 %v666_v55, %v666_v55 }
  0x4b   :  { %v187_v48 = vsel %vm186_vm5, %v160_v21, %v185_v37  ;;  %v298_v49 = vmul.f32 %v673_v59, %v673_v59  ;;  %v299_v50 = vmul.f32 %v675_v1, %v675_v1  ;;  %v300_v38 = vmul.f32 %v677_v60, %v677_v60 }
  0x4c   :  { %v189_v53 = vsel %vm188_vm6, %v167_v23, %v187_v48  ;;  %v301_v39 = vadd.f32 %v286_v27, %v285_v26  ;;  %v308_v54 = vadd.f32 %v288_v30, %v287_v24  ;;  %v315_v40 = vadd.f32 %v290_v18, %v289_v29 }
  0x4d   :  { %v322_v41 = vadd.f32 %v292_v34, %v291_v31  ;;  %v329_v55 = vadd.f32 %v294_v36, %v293_v35  ;;  %v336_v45 = vadd.f32 %v296_v43, %v295_v42  ;;  %v343_v51 = vadd.f32 %v298_v49, %v297_v44  ;;  %192 = vst [vmem:[#allocation7] sm:$0xff] %v189_v53 }
  0x4e   :  { %v302_v46 = vrot.slane %v301_v39, 4  ;;  %v309_v47 = vrot.slane %v308_v54, 4  ;;  %v316_v0 = vrot.slane %v315_v40, 4  ;;  %v350_v56 = vadd.f32 %v300_v38, %v299_v50 }
  0x4f   :  { %v323_v59 = vrot.slane %v322_v41, 4  ;;  %v330_v52 = vrot.slane %v329_v55, 4  ;;  %v337_v1 = vrot.slane %v336_v45, 4  ;;  %v344_v61 = vrot.slane %v343_v51, 4 }
  0x50   :  { %v303_v57 = vadd.f32 %v302_v46, %v301_v39  ;;  %v310_v60 = vadd.f32 %v309_v47, %v308_v54  ;;  %v317_v58 = vadd.f32 %v316_v0, %v315_v40 }
  0x51   :  { %497 = shalt.err (!%p494_p5)
}
  0x52   :  { %384 = dma.vmem_to_hbm [thread:$0]  %s382_s30, 128, %s764_s2, [#allocation4]   ;;  %v324_v62 = vadd.f32 %v323_v59, %v322_v41  ;;  %v331_v2 = vadd.f32 %v330_v52, %v329_v55  ;;  %v338_v63 = vadd.f32 %v337_v1, %v336_v45  ;;  %v351_v3 = vrot.slane %v350_v56, 4 }
  0x53   :  { %v304_v6 = vrot.slane %v303_v57, 2  ;;  %v311_v7 = vrot.slane %v310_v60, 2  ;;  %v318_v8 = vrot.slane %v317_v58, 2  ;;  %v345_v4 = vadd.f32 %v344_v61, %v343_v51  ;;  %s540_s2 = smov [#allocation10]  }
  0x54   :  { %v325_v5 = vrot.slane %v324_v62, 2  ;;  %v332_v9 = vrot.slane %v331_v2, 2  ;;  %v339_v10 = vrot.slane %v338_v63, 2  ;;  %v352_v11 = vadd.f32 %v351_v3, %v350_v56  ;;  %s401_s8 = sshll.u32 %s540_s2, 4  ;;  %s402_s8 = int_to_ptr.vmem [resolvable:$true] %s401_s8 }
  0x55   :  { %v305_v15 = vadd.f32 %v304_v6, %v303_v57  ;;  %v312_v12 = vadd.f32 %v311_v7, %v310_v60  ;;  %v319_v16 = vadd.f32 %v318_v8, %v317_v58  ;;  %v346_v13 = vrot.slane %v345_v4, 2  ;;  %s506_s9 = scalar_lea.vmem %s402_s8, 128  ;;  %p511_p7 = scmp.lt.s32.totalorder %s402_s8, %s402_s8 }
  0x56   :  { %v326_v17 = vadd.f32 %v325_v5, %v324_v62  ;;  %v333_v14 = vadd.f32 %v332_v9, %v331_v2  ;;  %v340_v19 = vadd.f32 %v339_v10, %v338_v63  ;;  %v353_v22 = vrot.slane %v352_v11, 2  ;;  %p507_p6 = scmp.ne.s32.totalorder %s402_s8, %s506_s9  ;;  %p512_p8 = scmp.lt.s32.totalorder %s506_s9, %s506_s9 }
  0x57   :  { %v306_v20 = vrot.slane %v305_v15, 1  ;;  %v313_v21 = vrot.slane %v312_v12, 1  ;;  %v320_v25 = vrot.slane %v319_v16, 1  ;;  %v347_v26 = vadd.f32 %v346_v13, %v345_v4 }
  0x58   :  { %v327_v27 = vrot.slane %v326_v17, 1  ;;  %v334_v23 = vrot.slane %v333_v14, 1  ;;  %v341_v28 = vrot.slane %v340_v19, 1  ;;  %v354_v24 = vadd.f32 %v353_v22, %v352_v11  ;;  %p513_p9 = por %p512_p8, %p511_p7 }
  0x59   :  { %v307_v30 = vadd.f32 %v306_v20, %v305_v15  ;;  %v314_v32 = vadd.f32 %v313_v21, %v312_v12  ;;  %v321_v29 = vadd.f32 %v320_v25, %v319_v16  ;;  %v348_v18 = vrot.slane %v347_v26, 1 }
  0x5a   :  { %v328_v31 = vadd.f32 %v327_v27, %v326_v17  ;;  %v335_v33 = vadd.f32 %v334_v23, %v333_v14  ;;  %v355_v34 = vrot.slane %v354_v24, 1  ;;  %v342_v35 = vadd.f32 %v341_v28, %v340_v19  ;;  %p514_p10 = pnand %p513_p9, %p507_p6 }
  0x5b   :  { %v365_v36 = vsel %vm176_vm0, %v314_v32, %v307_v30  ;;  %v349_v37 = vadd.f32 %v348_v18, %v347_v26 }
  0x5c   :  { %v366_v42 = vsel %vm178_vm1, %v321_v29, %v365_v36  ;;  %v356_v43 = vadd.f32 %v355_v34, %v354_v24 }
  0x5d   :  { %v367_v44 = vsel %vm180_vm2, %v328_v31, %v366_v42 }
  0x5e   :  { %v368_v48 = vsel %vm182_vm3, %v335_v33, %v367_v44 }
  0x5f   :  { %v369_v49 = vsel %vm184_vm4, %v342_v35, %v368_v48 }
  0x60   :  { %v370_v50 = vsel %vm186_vm5, %v349_v37, %v369_v49 }
  0x61   :  { %v371_v38 = vsel %vm188_vm6, %v356_v43, %v370_v50 }
  0x62   :  { %374 = vst [vmem:[#allocation10] sm:$0xff] %v371_v38 }
  0x63   :  { %517 = shalt.err (!%p514_p10)
}
  0x64   :  { %404 = dma.vmem_to_hbm [thread:$0]  %s402_s8, 128, %s766_s4, [#allocation9]  }
  0x65   :  { %530 = dma.done.wait [#allocation4], 128  }
  0x66   :  { %531 = vsyncadd [#allocation4], 4294967168 }
  0x67   :  { %532 = dma.done.wait [#allocation9], 256  }
  0x68   :  { %533 = vsyncadd [#allocation9], 4294967040 }
  0x69   :  { %414 = vsyncpa [#allocation3], 1 }
  0x6a   :  { %415 = vsyncpa [#allocation6], 1 }
  0x6b   :  { %416 = vsyncpa [#allocation4], 1 }
  0x6c   :  { %417 = vsyncpa [#allocation9], 1 }

</bundles_post_ra>
